<compile_context>
chip_gen: v7x
topology: tpu7x:2x2x1
jax: 0.10.0
libtpu: 0.0.40
codegen_flags: <defaults>
</compile_context>

<pallas_src>
import functools
from math import sqrt

import jax
import jax.numpy as jnp
from jax import lax
from jax.experimental import pallas as pl
from jax.experimental.pallas import tpu as pltpu


def _round_up(x, m):
    return (x + m - 1) // m * m


def _conv1d_tap_kernel(xa_ref, xh_ref, w_ref, b_ref, o_ref, win_ref, *,
                       dilation, t_tile, halo_r, c_in, c_in_p, k_taps):
    """One (batch, time-tile) grid step.

    xa_ref : (1, T_tile, C_in)          main input tile (compute dtype, true C_in)
    xh_ref : (1, halo_r, C_in)          halo rows immediately after the tile
    w_ref  : (K*C_in_p, C_out_p)        tap-major weight (resident)
    b_ref  : (1, C_out_p)               bias, f32 (resident)
    o_ref  : (1, T_tile, C_out_p)       output tile
    win_ref: (T_tile + halo_r, C_in_p)  scratch: lane-dense tile + halo window
    """
    # Zero the lane-pad columns.  The matching weight rows are zero so they
    # contribute nothing, but stale VMEM could hold NaN/Inf (0 * NaN = NaN).
    if c_in < c_in_p:
        win_ref[:, c_in:] = jnp.zeros((t_tile + halo_r, c_in_p - c_in),
                                      dtype=win_ref.dtype)

    # Assemble the halo'd window; both destination row ranges are sublane
    # aligned (t_tile is a multiple of halo_r, halo_r a multiple of 8).
    win_ref[0:t_tile, 0:c_in] = xa_ref[0]
    win_ref[t_tile:t_tile + halo_r, 0:c_in] = xh_ref[0]

    # K accumulating MXU matmuls over the sliding window (no im2col copies).
    # f32 accumulation; on v7x the partial sums can live in the MRB.
    acc = jnp.dot(win_ref[0:t_tile, :], w_ref[0:c_in_p, :],
                  preferred_element_type=jnp.float32)
    for k in range(1, k_taps):
        off = k * dilation
        acc = acc + jnp.dot(win_ref[off:off + t_tile, :],
                            w_ref[k * c_in_p:(k + 1) * c_in_p, :],
                            preferred_element_type=jnp.float32)

    # TODO(synk): fuse the downstream BatchNorm scale/shift + tanh/relu of
    # Tacotron2 here (two extra resident (1, C_out_p) inputs) for callers that
    # want the fused op; ConvNorm itself is just Conv1d + bias.
    o_ref[0] = (acc + b_ref[...]).astype(o_ref.dtype)


def conv_norm_forward_btc(x_btc, weight, bias, *, stride=1, padding=None,
                          dilation=1, t_tile_target=512,
                          compute_dtype=jnp.bfloat16, out_dtype=None):
    """Conv1d on (B, T, C_in) input; returns (B, T_out, C_out).

    compute_dtype=jnp.bfloat16 uses bf16 MXU products with f32 accumulation;
    pass compute_dtype=jnp.float32 for torch.nn.Conv1d numerical parity.
    """
    assert stride == 1, "Tacotron2's ConvNorm always uses stride=1"
    # TODO(synk): strided conv (ConvNorm's API allows it but never uses it).
    c_out, c_in, k_taps = weight.shape
    b, t, c_in_x = x_btc.shape
    assert c_in_x == c_in

    if padding is None:
        assert k_taps % 2 == 1
        padding = int(dilation * (k_taps - 1) // 2)
    padding = int(padding)
    t_out = t + 2 * padding - dilation * (k_taps - 1)
    assert t_out > 0
    out_dtype = x_btc.dtype if out_dtype is None else out_dtype

    halo = dilation * (k_taps - 1)
    halo_r = _round_up(max(halo, 1), 8)                  # sublane-aligned halo block
    t_tile = _round_up(min(t_tile_target, _round_up(t_out, 8)), halo_r)
    n_t = pl.cdiv(t_out, t_tile)
    # v7x has 2 TensorCores; make sure the grid has >= 2 steps when possible.
    if b * n_t < 2:
        t_half = _round_up(pl.cdiv(t_out, 2), halo_r)
        if 0 < t_half < t_tile:
            t_tile, n_t = t_half, pl.cdiv(t_out, t_half)
    t_total = n_t * t_tile + halo_r                      # padded time length
    halo_stride = t_tile // halo_r                       # halo block index scale

    c_in_p = _round_up(c_in, 128)                        # lane-dense MXU contraction
    c_out_p = _round_up(c_out, 128)                      # lane-dense output stores

    # Time pad + cast = one XLA copy over x.  Channels are NOT padded in HBM;
    # the kernel zero-fills the lane-pad columns of its VMEM window instead.
    x_pad = jnp.pad(x_btc.astype(compute_dtype),
                    ((0, 0), (padding, t_total - padding - t), (0, 0)))

    # Weight -> tap-major (K*C_in_p, C_out_p); bias -> (1, C_out_p) f32.
    w_kio = jnp.pad(jnp.transpose(weight, (2, 1, 0)).astype(compute_dtype),
                    ((0, 0), (0, c_in_p - c_in), (0, c_out_p - c_out)))
    w_col = w_kio.reshape(k_taps * c_in_p, c_out_p)
    b_2d = jnp.pad(bias.astype(jnp.float32), (0, c_out_p - c_out)).reshape(1, c_out_p)

    kernel = functools.partial(_conv1d_tap_kernel, dilation=dilation,
                               t_tile=t_tile, halo_r=halo_r,
                               c_in=c_in, c_in_p=c_in_p, k_taps=k_taps)

    # VMEM budget: streaming blocks double-buffered, resident weight counted at
    # <=2 buffers, window scratch + f32 accumulator, + compiler headroom.
    cdt = jnp.dtype(compute_dtype).itemsize
    odt = jnp.dtype(out_dtype).itemsize
    blocks = (2 * t_tile * c_in * cdt                    # main input tile
              + 2 * halo_r * c_in * cdt                  # halo tile
              + 2 * k_taps * c_in_p * c_out_p * cdt      # weight (resident)
              + 2 * c_out_p * 4                          # bias
              + 2 * t_tile * c_out_p * odt)              # output tile
    scratch = ((t_tile + halo_r) * c_in_p * cdt          # window scratch
               + 2 * t_tile * c_out_p * 4)               # f32 accumulator values
    vmem_limit = int(min(max(blocks + scratch + (8 << 20), 32 << 20), 48 << 20))

    cost = pl.CostEstimate(
        flops=2 * b * t_out * k_taps * c_in * c_out,
        transcendentals=0,
        bytes_accessed=int(x_pad.size * cdt + w_col.size * cdt + b_2d.size * 4
                           + b * n_t * t_tile * c_out_p * odt))

    def run(single_buffer_resident):
        resident = (dict(pipeline_mode=pl.Buffered(1))
                    if single_buffer_resident else {})
        return pl.pallas_call(
            kernel,
            out_shape=jax.ShapeDtypeStruct((b, n_t * t_tile, c_out_p), out_dtype),
            grid_spec=pltpu.PrefetchScalarGridSpec(
                num_scalar_prefetch=0,
                grid=(b, n_t),
                in_specs=[
                    # Main tile: rows [j*T_tile, (j+1)*T_tile), true C_in lanes.
                    pl.BlockSpec((1, t_tile, c_in), lambda i, j: (i, j, 0)),
                    # Halo: the halo_r rows right after the tile (block units of halo_r).
                    pl.BlockSpec((1, halo_r, c_in),
                                 lambda i, j: (i, (j + 1) * halo_stride, 0)),
                    # Weight & bias: constant index_map, fetched once, single buffered.
                    pl.BlockSpec((k_taps * c_in_p, c_out_p),
                                 lambda i, j: (0, 0), **resident),
                    pl.BlockSpec((1, c_out_p), lambda i, j: (0, 0), **resident),
                ],
                out_specs=pl.BlockSpec((1, t_tile, c_out_p), lambda i, j: (i, j, 0)),
                scratch_shapes=[
                    pltpu.VMEM((t_tile + halo_r, c_in_p), compute_dtype),  # window
                ],
            ),
            compiler_params=pltpu.CompilerParams(
                dimension_semantics=("parallel", "parallel"),
                vmem_limit_bytes=vmem_limit),
            cost_estimate=cost,
        )(x_pad, x_pad, w_col, b_2d)

    try:
        out = run(True)
    except Exception:
        # Fallback if this Pallas build rejects Buffered(1) on resident inputs.
        out = run(False)

    # Wrapper-side slice (extra HBM copy); layout-aware callers with
    # c_out == c_out_p can consume the padded slab directly instead.
    return out[:, :t_out, :c_out]


def conv_norm_forward(x_ncl, weight, bias, *, stride=1, padding=None, dilation=1,
                      compute_dtype=jnp.bfloat16):
    """torch.nn.Conv1d-compatible entry point: (B, C_in, T) -> (B, C_out, T_out).

    Note: the two transposes here each materialize an HBM copy; prefer
    conv_norm_forward_btc when the caller can work in (B, T, C) layout.
    """
    x_btc = jnp.transpose(x_ncl, (0, 2, 1))
    y_btc = conv_norm_forward_btc(x_btc, weight, bias, stride=stride,
                                  padding=padding, dilation=dilation,
                                  compute_dtype=compute_dtype)
    return jnp.transpose(y_btc, (0, 2, 1))


def init_conv_norm_params(key, in_channels, out_channels, kernel_size,
                          w_init_gain="linear"):
    """Deterministic xavier_uniform_ weight init + torch-style bias init."""
    kw, kb = jax.random.split(key)
    gain = 1.0  # torch.nn.init.calculate_gain('linear') == 1.0
    fan_in = in_channels * kernel_size
    fan_out = out_channels * kernel_size
    a = gain * sqrt(6.0 / (fan_in + fan_out))
    weight = jax.random.uniform(
        kw, (out_channels, in_channels, kernel_size),
        minval=-a, maxval=a, dtype=jnp.float32)
    bound = 1.0 / sqrt(fan_in)
    bias = jax.random.uniform(
        kb, (out_channels,), minval=-bound, maxval=bound, dtype=jnp.float32)
    return weight, bias


if __name__ == "__main__":
    # Small shapes consistent with ConvNorm's Conv1d: x is (B, C_in, T).
    B, C_IN, C_OUT, T = 2, 4, 8, 16

    key = jax.random.PRNGKey(0)
    kx, kp1, kp2 = jax.random.split(key, 3)
    x = jax.random.normal(kx, (B, C_IN, T), dtype=jnp.float32)

    # --- Test 1: K=5, dilation=1, default bf16 MXU compute -------------------
    K1 = 5
    w1, b1 = init_conv_norm_params(kp1, C_IN, C_OUT, K1)
    y1 = jax.block_until_ready(conv_norm_forward(x, w1, b1))   # padding=None -> "same"
    assert y1.shape == (B, C_OUT, T), y1.shape

    x_bf = x.astype(jnp.bfloat16).astype(jnp.float32)
    w_bf = w1.astype(jnp.bfloat16).astype(jnp.float32)
    pad1 = (K1 - 1) // 2
    y1_ref = lax.conv_general_dilated(
        x_bf, w_bf, window_strides=(1,), padding=((pad1, pad1),),
        rhs_dilation=(1,),
        dimension_numbers=("NCH", "OIH", "NCH")) + b1[None, :, None]
    err1 = float(jnp.max(jnp.abs(y1 - y1_ref)))
    assert jnp.allclose(y1, y1_ref, atol=1e-3, rtol=1e-3), f"max|diff|={err1}"

    # --- Test 2: K=3, dilation=2, f32 compute (torch-parity path) ------------
    K2, DIL2 = 3, 2
    w2, b2 = init_conv_norm_params(kp2, C_IN, C_OUT, K2)
    y2 = jax.block_until_ready(
        conv_norm_forward(x, w2, b2, dilation=DIL2, compute_dtype=jnp.float32))
    assert y2.shape == (B, C_OUT, T), y2.shape

    pad2 = DIL2 * (K2 - 1) // 2
    y2_ref = lax.conv_general_dilated(
        x, w2, window_strides=(1,), padding=((pad2, pad2),),
        rhs_dilation=(DIL2,),
        dimension_numbers=("NCH", "OIH", "NCH")) + b2[None, :, None]
    err2 = float(jnp.max(jnp.abs(y2 - y2_ref)))
    assert jnp.allclose(y2, y2_ref, atol=1e-4, rtol=1e-4), f"max|diff|={err2}"

    print("KERNEL_OK")
</pallas_src>

<mosaic_0001>
module attributes {stable_mosaic.version = 11 : i64} {
  func.func @_conv1d_tap_kernel(%arg0: i32, %arg1: i32, %arg2: memref<1x16x4xbf16, #tpu.memory_space<vmem>>, %arg3: memref<1x8x4xbf16, #tpu.memory_space<vmem>>, %arg4: memref<640x128xbf16, #tpu.memory_space<vmem>>, %arg5: memref<1x128xf32, #tpu.memory_space<vmem>>, %arg6: memref<1x16x128xf32, #tpu.memory_space<vmem>>, %arg7: memref<24x128xbf16, #tpu.memory_space<vmem>>) attributes {dimension_semantics = [#tpu.dimension_semantics<parallel>, #tpu.dimension_semantics<parallel>], iteration_bounds = array<i64: 2, 1>, scalar_prefetch = 0 : i64, scratch_operands = 1 : i64, tpu.core_type = #tpu.core_type<tc>, window_params = [{transform_indices = @transform_0, window_bounds = array<i64: 1, 16, 4>}, {transform_indices = @transform_1, window_bounds = array<i64: 1, 8, 4>}, {pipeline_mode = #tpu.pipeline_mode<synchronous>, transform_indices = @transform_2, window_bounds = array<i64: 640, 128>}, {pipeline_mode = #tpu.pipeline_mode<synchronous>, transform_indices = @transform_3, window_bounds = array<i64: 1, 128>}, {transform_indices = @transform_4, window_bounds = array<i64: 1, 16, 128>}]} {
    %cst = arith.constant 0.000000e+00 : bf16
    %0 = vector.broadcast %cst : bf16 to vector<24x124xbf16>
    %c0 = arith.constant 0 : index
    %c4 = arith.constant 4 : index
    %1 = vector.load %arg7[%c0, %c4] : memref<24x128xbf16, #tpu.memory_space<vmem>>, vector<24x124xbf16>
    tpu.vector_store %arg7[%c0, %c4], %0 {strides = array<i32>} : memref<24x128xbf16, #tpu.memory_space<vmem>>, vector<24x124xbf16>,
    %c0_0 = arith.constant 0 : index
    %c0_1 = arith.constant 0 : index
    %c0_2 = arith.constant 0 : index
    %2 = vector.load %arg2[%c0_0, %c0_1, %c0_2] : memref<1x16x4xbf16, #tpu.memory_space<vmem>>, vector<1x16x4xbf16>
    %3 = vector.shape_cast %2 : vector<1x16x4xbf16> to vector<16x4xbf16>
    %c0_3 = arith.constant 0 : index
    %c0_4 = arith.constant 0 : index
    %4 = vector.load %arg7[%c0_3, %c0_4] : memref<24x128xbf16, #tpu.memory_space<vmem>>, vector<16x4xbf16>
    tpu.vector_store %arg7[%c0_3, %c0_4], %3 {strides = array<i32>} : memref<24x128xbf16, #tpu.memory_space<vmem>>, vector<16x4xbf16>,
    %c0_5 = arith.constant 0 : index
    %c0_6 = arith.constant 0 : index
    %c0_7 = arith.constant 0 : index
    %5 = vector.load %arg3[%c0_5, %c0_6, %c0_7] : memref<1x8x4xbf16, #tpu.memory_space<vmem>>, vector<1x8x4xbf16>
    %6 = vector.shape_cast %5 : vector<1x8x4xbf16> to vector<8x4xbf16>
    %c16 = arith.constant 16 : index
    %c0_8 = arith.constant 0 : index
    %7 = vector.load %arg7[%c16, %c0_8] : memref<24x128xbf16, #tpu.memory_space<vmem>>, vector<8x4xbf16>
    tpu.vector_store %arg7[%c16, %c0_8], %6 {strides = array<i32>} : memref<24x128xbf16, #tpu.memory_space<vmem>>, vector<8x4xbf16>,
    %c0_9 = arith.constant 0 : index
    %c0_10 = arith.constant 0 : index
    %8 = vector.load %arg7[%c0_9, %c0_10] : memref<24x128xbf16, #tpu.memory_space<vmem>>, vector<16x128xbf16>
    %c0_11 = arith.constant 0 : index
    %c0_12 = arith.constant 0 : index
    %9 = vector.load %arg4[%c0_11, %c0_12] : memref<640x128xbf16, #tpu.memory_space<vmem>>, vector<128x128xbf16>
    %cst_13 = arith.constant dense<0.000000e+00> : vector<16x128xf32>
    %10 = tpu.matmul %8, %9, %cst_13 {dimension_numbers = #tpu.dot_dimension_numbers<[1], [0], [0], [1], [0, 0, 1, 1], [], []>} : vector<16x128xbf16>, vector<128x128xbf16>, vector<16x128xf32> -> vector<16x128xf32>
    %c1 = arith.constant 1 : index
    %c0_14 = arith.constant 0 : index
    %11 = vector.load %arg7[%c1, %c0_14] : memref<24x128xbf16, #tpu.memory_space<vmem>>, vector<16x128xbf16>
    %c128 = arith.constant 128 : index
    %c0_15 = arith.constant 0 : index
    %12 = vector.load %arg4[%c128, %c0_15] : memref<640x128xbf16, #tpu.memory_space<vmem>>, vector<128x128xbf16>
    %cst_16 = arith.constant dense<0.000000e+00> : vector<16x128xf32>
    %13 = tpu.matmul %11, %12, %cst_16 {dimension_numbers = #tpu.dot_dimension_numbers<[1], [0], [0], [1], [0, 0, 1, 1], [], []>} : vector<16x128xbf16>, vector<128x128xbf16>, vector<16x128xf32> -> vector<16x128xf32>
    %14 = arith.addf %10, %13 : vector<16x128xf32>
    %c2 = arith.constant 2 : index
    %c0_17 = arith.constant 0 : index
    %15 = vector.load %arg7[%c2, %c0_17] : memref<24x128xbf16, #tpu.memory_space<vmem>>, vector<16x128xbf16>
    %c256 = arith.constant 256 : index
    %c0_18 = arith.constant 0 : index
    %16 = vector.load %arg4[%c256, %c0_18] : memref<640x128xbf16, #tpu.memory_space<vmem>>, vector<128x128xbf16>
    %cst_19 = arith.constant dense<0.000000e+00> : vector<16x128xf32>
    %17 = tpu.matmul %15, %16, %cst_19 {dimension_numbers = #tpu.dot_dimension_numbers<[1], [0], [0], [1], [0, 0, 1, 1], [], []>} : vector<16x128xbf16>, vector<128x128xbf16>, vector<16x128xf32> -> vector<16x128xf32>
    %18 = arith.addf %14, %17 : vector<16x128xf32>
    %c3 = arith.constant 3 : index
    %c0_20 = arith.constant 0 : index
    %19 = vector.load %arg7[%c3, %c0_20] : memref<24x128xbf16, #tpu.memory_space<vmem>>, vector<16x128xbf16>
    %c384 = arith.constant 384 : index
    %c0_21 = arith.constant 0 : index
    %20 = vector.load %arg4[%c384, %c0_21] : memref<640x128xbf16, #tpu.memory_space<vmem>>, vector<128x128xbf16>
    %cst_22 = arith.constant dense<0.000000e+00> : vector<16x128xf32>
    %21 = tpu.matmul %19, %20, %cst_22 {dimension_numbers = #tpu.dot_dimension_numbers<[1], [0], [0], [1], [0, 0, 1, 1], [], []>} : vector<16x128xbf16>, vector<128x128xbf16>, vector<16x128xf32> -> vector<16x128xf32>
    %22 = arith.addf %18, %21 : vector<16x128xf32>
    %c4_23 = arith.constant 4 : index
    %c0_24 = arith.constant 0 : index
    %23 = vector.load %arg7[%c4_23, %c0_24] : memref<24x128xbf16, #tpu.memory_space<vmem>>, vector<16x128xbf16>
    %c512 = arith.constant 512 : index
    %c0_25 = arith.constant 0 : index
    %24 = vector.load %arg4[%c512, %c0_25] : memref<640x128xbf16, #tpu.memory_space<vmem>>, vector<128x128xbf16>
    %cst_26 = arith.constant dense<0.000000e+00> : vector<16x128xf32>
    %25 = tpu.matmul %23, %24, %cst_26 {dimension_numbers = #tpu.dot_dimension_numbers<[1], [0], [0], [1], [0, 0, 1, 1], [], []>} : vector<16x128xbf16>, vector<128x128xbf16>, vector<16x128xf32> -> vector<16x128xf32>
    %26 = arith.addf %22, %25 : vector<16x128xf32>
    %c0_27 = arith.constant 0 : index
    %c0_28 = arith.constant 0 : index
    %27 = vector.load %arg5[%c0_27, %c0_28] : memref<1x128xf32, #tpu.memory_space<vmem>>, vector<1x128xf32>
    %28 = vector.broadcast %27 : vector<1x128xf32> to vector<16x128xf32>
    %29 = arith.addf %26, %28 : vector<16x128xf32>
    %c0_29 = arith.constant 0 : index
    %c0_30 = arith.constant 0 : index
    %c0_31 = arith.constant 0 : index
    %30 = vector.load %arg6[%c0_29, %c0_30, %c0_31] : memref<1x16x128xf32, #tpu.memory_space<vmem>>, vector<1x16x128xf32>
    %31 = vector.shape_cast %30 : vector<1x16x128xf32> to vector<16x128xf32>
    %32 = vector.shape_cast %29 : vector<16x128xf32> to vector<1x16x128xf32>
    tpu.vector_store %arg6[%c0_29, %c0_30, %c0_31], %32 {strides = array<i32>} : memref<1x16x128xf32, #tpu.memory_space<vmem>>, vector<1x16x128xf32>,
    return
  }
  func.func @transform_0(%arg0: i32, %arg1: i32) -> (i32, i32, i32) {
    %c0_i32 = arith.constant 0 : i32
    %c0_i32_0 = arith.constant 0 : i32
    return %arg0, %arg1, %c0_i32 : i32, i32, i32
  }
  func.func @transform_1(%arg0: i32, %arg1: i32) -> (i32, i32, i32) {
    %c1_i32 = arith.constant 1 : i32
    %0 = arith.addi %arg1, %c1_i32 : i32
    %c2_i32 = arith.constant 2 : i32
    %1 = arith.muli %0, %c2_i32 : i32
    %c0_i32 = arith.constant 0 : i32
    %c0_i32_0 = arith.constant 0 : i32
    return %arg0, %1, %c0_i32 : i32, i32, i32
  }
  func.func @transform_2(%arg0: i32, %arg1: i32) -> (i32, i32) {
    %c0_i32 = arith.constant 0 : i32
    %c0_i32_0 = arith.constant 0 : i32
    %c0_i32_1 = arith.constant 0 : i32
    return %c0_i32, %c0_i32_0 : i32, i32
  }
  func.func @transform_3(%arg0: i32, %arg1: i32) -> (i32, i32) {
    %c0_i32 = arith.constant 0 : i32
    %c0_i32_0 = arith.constant 0 : i32
    %c0_i32_1 = arith.constant 0 : i32
    return %c0_i32, %c0_i32_0 : i32, i32
  }
  func.func @transform_4(%arg0: i32, %arg1: i32) -> (i32, i32, i32) {
    %c0_i32 = arith.constant 0 : i32
    %c0_i32_0 = arith.constant 0 : i32
    return %arg0, %arg1, %c0_i32 : i32, i32, i32
  }
}

module attributes {stable_mosaic.version = 11 : i64} {
  func.func @_conv1d_tap_kernel(%arg0: i32, %arg1: i32, %arg2: memref<1x16x4xbf16, #tpu.memory_space<vmem>>, %arg3: memref<1x8x4xbf16, #tpu.memory_space<vmem>>, %arg4: memref<640x128xbf16, #tpu.memory_space<vmem>>, %arg5: memref<1x128xf32, #tpu.memory_space<vmem>>, %arg6: memref<1x16x128xf32, #tpu.memory_space<vmem>>, %arg7: memref<24x128xbf16, #tpu.memory_space<vmem>>) attributes {dimension_semantics = [#tpu.dimension_semantics<parallel>, #tpu.dimension_semantics<parallel>], iteration_bounds = array<i64: 2, 1>, scalar_prefetch = 0 : i64, scratch_operands = 1 : i64, tpu.core_type = #tpu.core_type<tc>, window_params = [{transform_indices = @transform_0, window_bounds = array<i64: 1, 16, 4>}, {transform_indices = @transform_1, window_bounds = array<i64: 1, 8, 4>}, {pipeline_mode = #tpu.pipeline_mode<synchronous>, transform_indices = @transform_2, window_bounds = array<i64: 640, 128>}, {pipeline_mode = #tpu.pipeline_mode<synchronous>, transform_indices = @transform_3, window_bounds = array<i64: 1, 128>}, {transform_indices = @transform_4, window_bounds = array<i64: 1, 16, 128>}]} {
    %cst = arith.constant 0.000000e+00 : bf16
    %0 = vector.broadcast %cst : bf16 to vector<24x124xbf16>
    %c0 = arith.constant 0 : index
    %c4 = arith.constant 4 : index
    %1 = vector.load %arg7[%c0, %c4] : memref<24x128xbf16, #tpu.memory_space<vmem>>, vector<24x124xbf16>
    tpu.vector_store %arg7[%c0, %c4], %0 {strides = array<i32>} : memref<24x128xbf16, #tpu.memory_space<vmem>>, vector<24x124xbf16>,
    %c0_0 = arith.constant 0 : index
    %c0_1 = arith.constant 0 : index
    %c0_2 = arith.constant 0 : index
    %2 = vector.load %arg2[%c0_0, %c0_1, %c0_2] : memref<1x16x4xbf16, #tpu.memory_space<vmem>>, vector<1x16x4xbf16>
    %3 = vector.shape_cast %2 : vector<1x16x4xbf16> to vector<16x4xbf16>
    %c0_3 = arith.constant 0 : index
    %c0_4 = arith.constant 0 : index
    %4 = vector.load %arg7[%c0_3, %c0_4] : memref<24x128xbf16, #tpu.memory_space<vmem>>, vector<16x4xbf16>
    tpu.vector_store %arg7[%c0_3, %c0_4], %3 {strides = array<i32>} : memref<24x128xbf16, #tpu.memory_space<vmem>>, vector<16x4xbf16>,
    %c0_5 = arith.constant 0 : index
    %c0_6 = arith.constant 0 : index
    %c0_7 = arith.constant 0 : index
    %5 = vector.load %arg3[%c0_5, %c0_6, %c0_7] : memref<1x8x4xbf16, #tpu.memory_space<vmem>>, vector<1x8x4xbf16>
    %6 = vector.shape_cast %5 : vector<1x8x4xbf16> to vector<8x4xbf16>
    %c16 = arith.constant 16 : index
    %c0_8 = arith.constant 0 : index
    %7 = vector.load %arg7[%c16, %c0_8] : memref<24x128xbf16, #tpu.memory_space<vmem>>, vector<8x4xbf16>
    tpu.vector_store %arg7[%c16, %c0_8], %6 {strides = array<i32>} : memref<24x128xbf16, #tpu.memory_space<vmem>>, vector<8x4xbf16>,
    %c0_9 = arith.constant 0 : index
    %c0_10 = arith.constant 0 : index
    %8 = vector.load %arg7[%c0_9, %c0_10] : memref<24x128xbf16, #tpu.memory_space<vmem>>, vector<16x128xbf16>
    %c0_11 = arith.constant 0 : index
    %c0_12 = arith.constant 0 : index
    %9 = vector.load %arg4[%c0_11, %c0_12] : memref<640x128xbf16, #tpu.memory_space<vmem>>, vector<128x128xbf16>
    %cst_13 = arith.constant dense<0.000000e+00> : vector<16x128xf32>
    %10 = tpu.matmul %8, %9, %cst_13 {dimension_numbers = #tpu.dot_dimension_numbers<[1], [0], [0], [1], [0, 0, 1, 1], [], []>} : vector<16x128xbf16>, vector<128x128xbf16>, vector<16x128xf32> -> vector<16x128xf32>
    %c1 = arith.constant 1 : index
    %c0_14 = arith.constant 0 : index
    %11 = vector.load %arg7[%c1, %c0_14] : memref<24x128xbf16, #tpu.memory_space<vmem>>, vector<16x128xbf16>
    %c128 = arith.constant 128 : index
    %c0_15 = arith.constant 0 : index
    %12 = vector.load %arg4[%c128, %c0_15] : memref<640x128xbf16, #tpu.memory_space<vmem>>, vector<128x128xbf16>
    %cst_16 = arith.constant dense<0.000000e+00> : vector<16x128xf32>
    %13 = tpu.matmul %11, %12, %cst_16 {dimension_numbers = #tpu.dot_dimension_numbers<[1], [0], [0], [1], [0, 0, 1, 1], [], []>} : vector<16x128xbf16>, vector<128x128xbf16>, vector<16x128xf32> -> vector<16x128xf32>
    %14 = arith.addf %10, %13 : vector<16x128xf32>
    %c2 = arith.constant 2 : index
    %c0_17 = arith.constant 0 : index
    %15 = vector.load %arg7[%c2, %c0_17] : memref<24x128xbf16, #tpu.memory_space<vmem>>, vector<16x128xbf16>
    %c256 = arith.constant 256 : index
    %c0_18 = arith.constant 0 : index
    %16 = vector.load %arg4[%c256, %c0_18] : memref<640x128xbf16, #tpu.memory_space<vmem>>, vector<128x128xbf16>
    %cst_19 = arith.constant dense<0.000000e+00> : vector<16x128xf32>
    %17 = tpu.matmul %15, %16, %cst_19 {dimension_numbers = #tpu.dot_dimension_numbers<[1], [0], [0], [1], [0, 0, 1, 1], [], []>} : vector<16x128xbf16>, vector<128x128xbf16>, vector<16x128xf32> -> vector<16x128xf32>
    %18 = arith.addf %14, %17 : vector<16x128xf32>
    %c3 = arith.constant 3 : index
    %c0_20 = arith.constant 0 : index
    %19 = vector.load %arg7[%c3, %c0_20] : memref<24x128xbf16, #tpu.memory_space<vmem>>, vector<16x128xbf16>
    %c384 = arith.constant 384 : index
    %c0_21 = arith.constant 0 : index
    %20 = vector.load %arg4[%c384, %c0_21] : memref<640x128xbf16, #tpu.memory_space<vmem>>, vector<128x128xbf16>
    %cst_22 = arith.constant dense<0.000000e+00> : vector<16x128xf32>
    %21 = tpu.matmul %19, %20, %cst_22 {dimension_numbers = #tpu.dot_dimension_numbers<[1], [0], [0], [1], [0, 0, 1, 1], [], []>} : vector<16x128xbf16>, vector<128x128xbf16>, vector<16x128xf32> -> vector<16x128xf32>
    %22 = arith.addf %18, %21 : vector<16x128xf32>
    %c4_23 = arith.constant 4 : index
    %c0_24 = arith.constant 0 : index
    %23 = vector.load %arg7[%c4_23, %c0_24] : memref<24x128xbf16, #tpu.memory_space<vmem>>, vector<16x128xbf16>
    %c512 = arith.constant 512 : index
    %c0_25 = arith.constant 0 : index
    %24 = vector.load %arg4[%c512, %c0_25] : memref<640x128xbf16, #tpu.memory_space<vmem>>, vector<128x128xbf16>
    %cst_26 = arith.constant dense<0.000000e+00> : vector<16x128xf32>
    %25 = tpu.matmul %23, %24, %cst_26 {dimension_numbers = #tpu.dot_dimension_numbers<[1], [0], [0], [1], [0, 0, 1, 1], [], []>} : vector<16x128xbf16>, vector<128x128xbf16>, vector<16x128xf32> -> vector<16x128xf32>
    %26 = arith.addf %22, %25 : vector<16x128xf32>
    %c0_27 = arith.constant 0 : index
    %c0_28 = arith.constant 0 : index
    %27 = vector.load %arg5[%c0_27, %c0_28] : memref<1x128xf32, #tpu.memory_space<vmem>>, vector<1x128xf32>
    %28 = vector.broadcast %27 : vector<1x128xf32> to vector<16x128xf32>
    %29 = arith.addf %26, %28 : vector<16x128xf32>
    %c0_29 = arith.constant 0 : index
    %c0_30 = arith.constant 0 : index
    %c0_31 = arith.constant 0 : index
    %30 = vector.load %arg6[%c0_29, %c0_30, %c0_31] : memref<1x16x128xf32, #tpu.memory_space<vmem>>, vector<1x16x128xf32>
    %31 = vector.shape_cast %30 : vector<1x16x128xf32> to vector<16x128xf32>
    %32 = vector.shape_cast %29 : vector<16x128xf32> to vector<1x16x128xf32>
    tpu.vector_store %arg6[%c0_29, %c0_30, %c0_31], %32 {strides = array<i32>} : memref<1x16x128xf32, #tpu.memory_space<vmem>>, vector<1x16x128xf32>,
    return
  }
  func.func @transform_0(%arg0: i32, %arg1: i32) -> (i32, i32, i32) {
    %c0_i32 = arith.constant 0 : i32
    %c0_i32_0 = arith.constant 0 : i32
    return %arg0, %arg1, %c0_i32 : i32, i32, i32
  }
  func.func @transform_1(%arg0: i32, %arg1: i32) -> (i32, i32, i32) {
    %c1_i32 = arith.constant 1 : i32
    %0 = arith.addi %arg1, %c1_i32 : i32
    %c2_i32 = arith.constant 2 : i32
    %1 = arith.muli %0, %c2_i32 : i32
    %c0_i32 = arith.constant 0 : i32
    %c0_i32_0 = arith.constant 0 : i32
    return %arg0, %1, %c0_i32 : i32, i32, i32
  }
  func.func @transform_2(%arg0: i32, %arg1: i32) -> (i32, i32) {
    %c0_i32 = arith.constant 0 : i32
    %c0_i32_0 = arith.constant 0 : i32
    %c0_i32_1 = arith.constant 0 : i32
    return %c0_i32, %c0_i32_0 : i32, i32
  }
  func.func @transform_3(%arg0: i32, %arg1: i32) -> (i32, i32) {
    %c0_i32 = arith.constant 0 : i32
    %c0_i32_0 = arith.constant 0 : i32
    %c0_i32_1 = arith.constant 0 : i32
    return %c0_i32, %c0_i32_0 : i32, i32
  }
  func.func @transform_4(%arg0: i32, %arg1: i32) -> (i32, i32, i32) {
    %c0_i32 = arith.constant 0 : i32
    %c0_i32_0 = arith.constant 0 : i32
    return %arg0, %arg1, %c0_i32 : i32, i32, i32
  }
}

</mosaic_0001>

<bundles_post_ra>
// kernel: tpu_custom_call.1
= control target key start
LH: loop header
LB: loop body
LE: loop exit
PB: predicated region body
PF: predicated region fallthrough
CT: control target
= control target key end

     0   :  { %9 = vsyncpa [#allocation4], 0  ;;  %s1761_s0 = inlined_call_operand.vmem [shape: bf16[2,24,4], index: 0, kind: input, shape index: {}]   ;;  %s1762_s1 = inlined_call_operand.vmem [shape: bf16[2,24,4], index: 1, kind: input, shape index: {}]   ;;  %s1763_s2 = inlined_call_operand.hbm [shape: bf16[640,128], index: 2, kind: input, shape index: {}]   ;;  %s1764_s3 = inlined_call_operand.vmem [shape: f32[1,128], index: 3, kind: input, shape index: {}]   ;;  %s1765_s4 = inlined_call_operand.hbm [shape: f32[2,16,128], index: 4, kind: output, shape index: {}]  }
   0x1   :  { %10 = vsyncpa [#allocation5], 0 }
   0x2   :  { %12 = vsyncpa [#allocation5 + $0x1], 0  ;;  %s1538_s15 = smov 0   ;;  %s1540_s16 = smov 0  }
   0x3   :  { %s1542_s17 = smov 0   ;;  %s1544_s18 = smov 0  }
   0x4   :  { %s1546_s19 = smov 0   ;;  %s1548_s20 = smov 0  }
   0x5 LB: > { %s1060_s21 = sadd.s32 4294967295, %s1502_s20   ;;  %s1061_s22 = sadd.s32 4294967294, %s1502_s20   ;;  %s1502_s20 = sphi %s1548_s20, %s18_s20   ;;  %s1498_s19 = sphi %s1546_s19, %s1783_s19   ;;  %s1494_s18 = sphi %s1544_s18, %s1782_s18   ;;  %s1490_s17 = sphi %s1542_s17, %s1781_s17   ;;  %s1486_s16 = sphi %s1540_s16, %s1780_s16   ;;  %s1482_s15 = sphi %s1538_s15, %s1779_s15  }
   0x6   : > { %s30_s23 = sadd.s32 1, %s1498_s19  ;;  %s141_s24 = sadd.s32 1, %s1490_s17 }
   0x7   : > { %p32_p0 = scmp.ge.s32.totalorder %s30_s23, 2  ;;  %p151_p1 = scmp.ne.s32.totalorder %s1490_s17, %s1486_s16 }
   0x8   : > { %p152_p2 = scmp.eq.s32.totalorder %s1060_s21, 1  ;;  %p157_p3 = scmp.ne.s32.totalorder %s1486_s16, %s1482_s15 }
   0x9   : > { %s1785_s23 = smov (%p32_p0, %s30_s23), 0  ;;  %p158_p5 = scmp.eq.s32.totalorder %s1061_s22, 1 }
   0xa   : > { %p1578_p4 = por %p152_p2, %p151_p1  ;;  %s136_s26 = ssub.s32 %s1498_s19, %s1785_s23 }
   0xb   : > { %p1062_p6 = scmp.ge.s32.totalorder %s1502_s20, 1  ;;  %p139_p7 = scmp.eq.s32.totalorder %s136_s26, 0 }
   0xc   : > { %s1770_s25 = scalar_select %p1578_p4, 1, 0 }
   0xd   : > { %p1585_p8 = por %p158_p5, %p157_p3  ;;  %p165_p9 = scmp.lt.s32.totalorder %s1502_s20, 3 }
   0xe   : > { %s1591_s28 = scalar_select %p139_p7, %s1490_s17, %s141_s24  }
   0xf   : > { %s1771_s27 = scalar_select %p1585_p8, 1, 0 }
  0x10   : > { %p1593_p10 = pnand %p1062_p6, %p165_p9  ;;  %p1597_p11 = scmp.eq.s32.totalorder %s1060_s21, 0 }
  0x11   : > { %s1504_s5 = smov [#allocation3]   ;;  %s1392_s10 = scalar_lea.hbm %s1763_s2, 5120 }
  0x12   : > { %s1772_s29 = scalar_select %p1593_p10, 1, 0 }
  0x13   : > { %s1773_s30 = scalar_select %p1597_p11, 1, 0 }
  0x14   : > { %p1278_p12 = pneg %p1593_p10  ;;  %s177_s6 = sshll.u32 %s1504_s5, 4  ;;  %s178_s6 = int_to_ptr.vmem [resolvable:$true] %s177_s6 }
  0x15   : > { %p1393_p0 = scmp.ne.s32.totalorder %s1763_s2, %s1392_s10  ;;  %p1399_p5 = scmp.lt.u32.totalorder %s1392_s10, %s1763_s2 }
  0x16   : > { %p1605_p13 = pnand %p1597_p11, %p1278_p12 }
  0x18   : > { %p1394_p1 = pneg %p1605_p13 }
  0x1a   : > { %p1395_p2 = pnand %p1394_p1, %p1393_p0 }
  0x1c   : > { %p1396_p3 = pneg %p1395_p2 }
  0x1e   : > { %p1401_p6 = pnand %p1399_p5, %p1396_p3 }
  0x20   : > { %1404 = shalt.err (!%p1401_p6)
}
  0x21   : > { %s1405_s21 = scalar_lea.vmem %s178_s6, 5120  ;;  %p1413_p8 = scmp.lt.s32.totalorder %s178_s6, %s178_s6 }
  0x22   : > { %p1406_p7 = scmp.ne.s32.totalorder %s178_s6, %s1405_s21  ;;  %p1414_p4 = scmp.lt.s32.totalorder %s1405_s21, %s1405_s21 }
  0x24   : > { %p1408_p9 = pnand %p1406_p7, %p1394_p1  ;;  %p1415_p11 = por %p1414_p4, %p1413_p8 }
  0x26   : > { %p1409_p12 = pneg %p1408_p9 }
  0x28   : > { %p1416_p10 = pnand %p1415_p11, %p1409_p12 }
  0x2a   : > { %1419 = shalt.err (!%p1416_p10)
}
  0x2b   : > { %s1505_s22 = smov 64   ;;  %s1506_s24 = smov 4  }
  0x2c   : > { %1281 = dma.hbm_to_vmem [thread:$0]  (!%p1605_p13), %s1763_s2, 5120, %s178_s6, [#allocation4], %s1505_s22, %s1505_s22, %s1506_s24  }
  0x2d   : > { %p1775_p0 = scmp.ne.s32.totalorder %s1772_s29, 0 }
  0x2e   : > { %p1776_p2 = scmp.ne.s32.totalorder (!%p1775_p0), %s1773_s30, 0 }
  0x2f   : > { %232 = sbr.rel (%p1775_p0) target bundleno = 386 (0x182), region = 36 }
  0x36   : > { %1473 = dma.done.wait (%p1776_p2), [#allocation4], 5120  }
  0x37   : > { %1475 = vsyncadd (%p1776_p2), [#allocation4], 4294962176  ;;  %p281_p4 = scmp.lt.s32.totalorder %s1494_s18, 1  ;;  %vm308_vm0 = vcmask 1043488   ;;  %v1507_v0 = vmov 0.0   ;;  %vm1508_vm1 = vmmov 0  }
  0x38   : > { %1170 = vmatprep.subr.bf16.mxu0 %v1507_v0  ;;  %1190 = vmatprep.subr.bf16.mxu1 %v1507_v0  ;;  %v1509_v1 = vmov 0   ;;  %v1346_v2 = vld [vmem:[#allocation3 + $0x40] sm:$0xff]   ;;  %v1348_v4 = vld [vmem:[#allocation3 + $0x48] sm:$0xff]   ;;  %v1350_v6 = vld [vmem:[#allocation3 + $0x50] sm:$0xff]   ;;  %vm314_vm2 = vcmask 27648   ;;  %vm582_vm4 = vcmask 1046528  }
  0x39   : > { %1186 = vmatprep.mubr.msk.bf16.mxu0 %vm1508_vm1, %v1507_v0  ;;  %1206 = vmatprep.mubr.msk.bf16.mxu1 %vm1508_vm1, %v1507_v0  ;;  %309 = vst.msk [vmem:[#allocation2] sm:$0xf] %vm308_vm0, %v1509_v1  ;;  %310 = vst.msk [vmem:[#allocation2 + $0x4] sm:$0xf] %vm308_vm0, %v1509_v1  ;;  %s282_s29 = scalar_select %p281_p4, %s1494_s18, 1  ;;  %v1347_v3 = vld [vmem:[#allocation3] sm:$0xff]  }
  0x3a   : > { %311 = vst.msk [vmem:[#allocation2 + $0x8] sm:$0xf] %vm308_vm0, %v1509_v1  ;;  %1171 = vmatpush3.bf16.msra.mxu0 %v1346_v2  ;;  %1191 = vmatpush3.bf16.msra.mxu1 %v1347_v3  ;;  %v1349_v5 = vld [vmem:[#allocation3 + $0x8] sm:$0xff]   ;;  %v1351_v7 = vld [vmem:[#allocation3 + $0x10] sm:$0xff]   ;;  %v1352_v8 = vld [vmem:[#allocation3 + $0x58] sm:$0xff]   ;;  %vm828_vm6 = vcmask 1045504  }
  0x3b   : > { %1172 = vmatprep.subr.bf16.mxu0 %v1507_v0  ;;  %1192 = vmatprep.subr.bf16.mxu1 %v1507_v0  ;;  %s1270_s30 = smul.u32 12, %s282_s29  ;;  %v1353_v9 = vld [vmem:[#allocation3 + $0x18] sm:$0xff]   ;;  %v1354_v10 = vld [vmem:[#allocation3 + $0x60] sm:$0xff]   ;;  %v1356_v15 = vld [vmem:[#allocation3 + $0x68] sm:$0xff]   ;;  %vm364_vm3 = vsmask.f32 7424 }
  0x3c   : > { %v1355_v11 = vld [vmem:[#allocation3 + $0x20] sm:$0xff]   ;;  %v1357_v16 = vld [vmem:[#allocation3 + $0x28] sm:$0xff]   ;;  %v1358_v17 = vld [vmem:[#allocation3 + $0x70] sm:$0xff]   ;;  %vm698_vm5 = vsmask.f32 6400  ;;  %s273_s13 = sand.u32 1, %s1486_s16  }
  0x3d   : > { %s1123_s6 = sadd.s32 8, %s1270_s30  ;;  %s288_s9 = scalar_lea.vmem %s1761_s0, %s1270_s30  ;;  %v1359_v18 = vld [vmem:[#allocation3 + $0x30] sm:$0xff]   ;;  %v1360_v21 = vld [vmem:[#allocation3 + $0x78] sm:$0xff]   ;;  %v1365_v31 = vld [vmem:[#allocation3 + $0x80] sm:$0xff]  }
  0x3e   : > { %1173 = vmatpush3.bf16.msra.mxu0 %v1348_v4  ;;  %1193 = vmatpush3.bf16.msra.mxu1 %v1349_v5  ;;  %s303_s12 = scalar_lea.vmem %s1762_s1, %s1123_s6  ;;  %v312_v12 = vld [vmem:[%s288_s9] sm:$0xf]  ;;  %v313_v13 = vld [vmem:[%s288_s9 + $0x4] sm:$0xf]  ;;  %v1367_v35 = vld [vmem:[#allocation3 + $0x88] sm:$0xff]   ;;  %s1067_s14 = sshll.u32 %s273_s13, 4 }
  0x3f   : > { %1174 = vmatprep.subr.bf16.mxu0 %v1507_v0  ;;  %1194 = vmatprep.subr.bf16.mxu1 %v1507_v0  ;;  %v317_v14 = vld [vmem:[%s303_s12] sm:$0xf]  ;;  %315 = vst.msk [vmem:[#allocation2] sm:$0xf] %vm314_vm2, %v312_v12  ;;  %316 = vst.msk [vmem:[#allocation2 + $0x4] sm:$0xf] %vm314_vm2, %v313_v13 }
  0x40   : > { %318 = vst.msk [vmem:[#allocation2 + $0x8] sm:$0xf] %vm314_vm2, %v317_v14  ;;  %v1361_v24 = vld [vmem:[#allocation3 + $0x38] sm:$0xff]   ;;  %v1366_v33 = vld [vmem:[#allocation3 + $0xc0] sm:$0xff]   ;;  %v1368_v36 = vld [vmem:[#allocation3 + $0xc8] sm:$0xff]   ;;  %s275_s24 = scalar_lea.vmem [#allocation6], %s1067_s14 }
  0x41   : > { %v1369_v37 = vld [vmem:[#allocation3 + $0x90] sm:$0xff]   ;;  %v1371_v39 = vld [vmem:[#allocation3 + $0x98] sm:$0xff]   ;;  %v1373_v42 = vld [vmem:[#allocation3 + $0xa0] sm:$0xff]   ;;  %s951_s26 = sshll.u32 %s275_s24, 4  ;;  %s1124_s5 = sshll.u32 %s1494_s18, 8  ;;  %s1708_s26 = int_to_ptr.vmem [resolvable:$true] %s951_s26 }
  0x42   : > { %1175 = vmatpush3.bf16.msra.mxu0 %v1350_v6  ;;  %1195 = vmatpush3.bf16.msra.mxu1 %v1351_v7  ;;  %v1370_v38 = vld [vmem:[#allocation3 + $0xd0] sm:$0xff]   ;;  %v1372_v40 = vld [vmem:[#allocation3 + $0xd8] sm:$0xff]   ;;  %v1374_v43 = vld [vmem:[#allocation3 + $0xe0] sm:$0xff]   ;;  %s1713_s6 = scalar_lea.hbm %s1765_s4, %s1124_s5  ;;  %s1715_s7 = scalar_lea.sflag [#allocation5], %s273_s13 }
  0x43   : > { %1176 = vmatprep.subr.bf16.mxu0 %v1507_v0  ;;  %1196 = vmatprep.subr.bf16.mxu1 %v1507_v0  ;;  %v1375_v46 = vld [vmem:[#allocation3 + $0xa8] sm:$0xff]   ;;  %v1377_v52 = vld [vmem:[#allocation3 + $0xb0] sm:$0xff]   ;;  %v1379_v58 = vld [vmem:[#allocation3 + $0xb8] sm:$0xff]   ;;  %s1420_s18 = scalar_lea.vmem %s1708_s26, 256  ;;  %p1777_p10 = scmp.ne.s32.totalorder %s1770_s25, 0 }
  0x44   : > { %v1376_v47 = vld [vmem:[#allocation3 + $0xe8] sm:$0xff]   ;;  %v1378_v53 = vld [vmem:[#allocation3 + $0xf0] sm:$0xff]   ;;  %v1380_v59 = vld [vmem:[#allocation3 + $0xf8] sm:$0xff]   ;;  %p1421_p8 = scmp.ne.s32.totalorder %s1708_s26, %s1420_s18  ;;  %s1510_s8 = smov [#allocation6]  }
  0x45   : > { %v1382_v2 = vld [vmem:[#allocation3 + $0x100] sm:$0xff]   ;;  %v1384_v4 = vld [vmem:[#allocation3 + $0x108] sm:$0xff]   ;;  %v1385_v5 = vld [vmem:[#allocation3 + $0x110] sm:$0xff]   ;;  %s1424_s9 = sshll.u32 %s1510_s8, 4  ;;  %s1425_s9 = int_to_ptr.vmem [resolvable:$false] %s1424_s9 }
  0x46   : > { %1177 = vmatpush3.bf16.msra.mxu0 %v1352_v8  ;;  %1197 = vmatpush3.bf16.msra.mxu1 %v1353_v9  ;;  %v337_v19 = vld [vmem:[#allocation2] sm:$0xf]  ;;  %v1657_v20 = vld [vmem:[#allocation2 + $0x4] sm:$0xf]  ;;  %v1387_v7 = vld [vmem:[#allocation3 + $0x120] sm:$0xff]   ;;  %p1422_p11 = pnand %p1421_p8, %p1777_p10  ;;  %s1426_s10 = scalar_lea.vmem %s1425_s9, 512 }
  0x47   : > { %1178 = vmatprep.subr.bf16.mxu0 %v1507_v0  ;;  %1198 = vmatprep.subr.bf16.mxu1 %v1507_v0  ;;  %v1070_v22 = vcombine.low %v337_v19, %v1657_v20  ;;  %v1660_v23 = vld [vmem:[#allocation2 + $0x8] ss:$0 sps:$4 sm:$0x11]   ;;  %v1364_v30 = vld [vmem:[#allocation2] sm:$0xff]   ;;  %v1388_v8 = vld [vmem:[#allocation3 + $0x128] sm:$0xff]   ;;  %p1427_p1 = scmp.lt.s32.totalorder %s1708_s26, %s1425_s9  ;;  %p1428_p3 = scmp.lt.s32.totalorder %s1426_s10, %s1420_s18 }
  0x48   : > { %v373_v27 = vshll.u32 %v1660_v23, 16  ;;  %v562_v41 = vld [vmem:[#allocation2] sm:$0xe]  ;;  %v1678_v45 = vld [vmem:[#allocation2 + $0x8] ss:$0 sps:$4 sm:$0x33]   ;;  %p1423_p13 = pneg %p1422_p11 }
  0x49   : > { %v366_v25 = vshrl.u32 %v1070_v22, 16  ;;  %v368_v26 = vshll.u32 %v1070_v22, 16  ;;  %v1089_v44 = vcombine.low %v562_v41, %v1657_v20  ;;  %v708_v50 = vshrl.u32 %v1678_v45, 16  ;;  %v1386_v6 = vld [vmem:[#allocation3 + $0x118] sm:$0xff]   ;;  %v808_v9 = vld [vmem:[#allocation2] sm:$0xc]  ;;  %p1429_p5 = por %p1428_p3, %p1427_p1 }
  0x4a   : > { %1179 = vmatpush3.bf16.msra.mxu0 %v1354_v10  ;;  %1199 = vmatpush3.bf16.msra.mxu1 %v1355_v11  ;;  %v375_v29 = vrot.slane %v373_v27, 1  ;;  %v711_v51 = vshll.u32 %v1678_v45, 16  ;;  %v584_v61 = vrot.slane %v1660_v23, 1  ;;  %v1389_v10 = vld [vmem:[#allocation3 + $0x130] sm:$0xff]   ;;  %v1107_v11 = vcombine.low %v808_v9, %v1657_v20  ;;  %v1390_v12 = vld [vmem:[#allocation3 + $0x138] sm:$0xff]  }
  0x4b   : > { %1180 = vmatprep.subr.bf16.mxu0 %v1507_v0  ;;  %1200 = vmatprep.subr.bf16.mxu1 %v1507_v0  ;;  %v370_v28 = vrot.slane %v368_v26, 1  ;;  %v700_v48 = vshrl.u32 %v1089_v44, 16  ;;  %v703_v49 = vshll.u32 %v1089_v44, 16  ;;  %v710_v56 = vrot.slane %v708_v50, 1  ;;  %p1430_p6 = pnand %p1429_p5, %p1423_p13 }
  0x4c   : > { %v713_v57 = vrot.slane %v711_v51, 2  ;;  %v583_v60 = vrot.slane %v1089_v44, 1  ;;  %v829_v13 = vrot.slane %v1107_v11, 2  ;;  %v830_v14 = vrot.slane %v1678_v45, 2 }
  0x4d   : > { %v371_v32 = vor.u32 %v370_v28, %v366_v25  ;;  %v702_v54 = vrot.slane %v700_v48, 1  ;;  %v705_v55 = vrot.slane %v703_v49, 2 }
  0x4e   : > { %1181 = vmatpush3.bf16.msra.mxu0 %v1356_v15  ;;  %1201 = vmatpush3.bf16.msra.mxu1 %v1357_v16  ;;  %v714_v63 = vor.u32 %v713_v57, %v710_v56  ;;  %v585_v1 = vsel %vm582_vm4, %v583_v60, %v584_v61  ;;  %v831_v15 = vsel %vm828_vm6, %v829_v13, %v830_v14 }
  0x4f   : > { %1182 = vmatprep.subr.bf16.mxu0 %v1507_v0  ;;  %1202 = vmatprep.subr.bf16.mxu1 %v1507_v0  ;;  %v376_v34 = vsel %vm364_vm3, %v371_v32, %v375_v29  ;;  %v706_v62 = vor.u32 %v705_v55, %v702_v54 }
  0x51   : > { %v715_v3 = vsel %vm698_vm5, %v706_v62, %v714_v63 }
  0x52   : > { %1183 = vmatpush3.bf16.msra.mxu0 %v1358_v17  ;;  %1203 = vmatpush3.bf16.msra.mxu1 %v1359_v18 }
  0x53   : > { %1184 = vmatprep.subr.bf16.mxu0 %v1507_v0  ;;  %1204 = vmatprep.subr.bf16.mxu1 %v1507_v0 }
  0x56   : > { %1185 = vmatpush3.bf16.msra.mxu0 %v1360_v21  ;;  %1205 = vmatpush3.bf16.msra.mxu1 %v1361_v24 }
  0x57   : > { %1210 = vmatprep.subr.bf16.mxu0 %v1507_v0  ;;  %1230 = vmatprep.subr.bf16.mxu1 %v1507_v0 }
  0x59   : > { %1187 = vmatmul.mubr.bf16.vlgmr.msra.gmra.mrb[0].mxu0 %v376_v34  ;;  %1207 = vmatmul.mubr.bf16.vlgmr.msra.gmra.mrb[0].mxu1 %v1364_v30 }
  0x5a   : > { %1211 = vmatpush3.bf16.msra.mxu0 %v1365_v31  ;;  %1231 = vmatpush3.bf16.msra.mxu1 %v1366_v33 }
  0x5b   : > { %1212 = vmatprep.subr.bf16.mxu0 %v1507_v0  ;;  %1232 = vmatprep.subr.bf16.mxu1 %v1507_v0 }
  0x5c   : > { %1226 = vmatprep.mubr.msk.bf16.mxu0 %vm1508_vm1, %v1507_v0  ;;  %1246 = vmatprep.mubr.msk.bf16.mxu1 %vm1508_vm1, %v1507_v0 }
  0x5e   : > { %1213 = vmatpush3.bf16.msra.mxu0 %v1367_v35  ;;  %1233 = vmatpush3.bf16.msra.mxu1 %v1368_v36 }
  0x5f   : > { %1214 = vmatprep.subr.bf16.mxu0 %v1507_v0  ;;  %1234 = vmatprep.subr.bf16.mxu1 %v1507_v0 }
  0x62   : > { %1215 = vmatpush3.bf16.msra.mxu0 %v1369_v37  ;;  %1235 = vmatpush3.bf16.msra.mxu1 %v1370_v38  ;;  %v1116_v38 = vld [vmem:[%s1764_s3] ss:$0 sm:$0xff] }
  0x63   : > { %1216 = vmatprep.subr.bf16.mxu0 %v1507_v0  ;;  %1236 = vmatprep.subr.bf16.mxu1 %v1507_v0 }
  0x66   : > { %1217 = vmatpush3.bf16.msra.mxu0 %v1371_v39  ;;  %1237 = vmatpush3.bf16.msra.mxu1 %v1372_v40 }
  0x67   : > { %1218 = vmatprep.subr.bf16.mxu0 %v1507_v0  ;;  %1238 = vmatprep.subr.bf16.mxu1 %v1507_v0 }
  0x6a   : > { %1219 = vmatpush3.bf16.msra.mxu0 %v1373_v42  ;;  %1239 = vmatpush3.bf16.msra.mxu1 %v1374_v43 }
  0x6b   : > { %1220 = vmatprep.subr.bf16.mxu0 %v1507_v0  ;;  %1240 = vmatprep.subr.bf16.mxu1 %v1507_v0 }
  0x6e   : > { %1221 = vmatpush3.bf16.msra.mxu0 %v1375_v46  ;;  %1241 = vmatpush3.bf16.msra.mxu1 %v1376_v47 }
  0x6f   : > { %1222 = vmatprep.subr.bf16.mxu0 %v1507_v0  ;;  %1242 = vmatprep.subr.bf16.mxu1 %v1507_v0 }
  0x72   : > { %1223 = vmatpush3.bf16.msra.mxu0 %v1377_v52  ;;  %1243 = vmatpush3.bf16.msra.mxu1 %v1378_v53 }
  0x73   : > { %1224 = vmatprep.subr.bf16.mxu0 %v1507_v0  ;;  %1244 = vmatprep.subr.bf16.mxu1 %v1507_v0 }
  0x76   : > { %1225 = vmatpush3.bf16.msra.mxu0 %v1379_v58  ;;  %1245 = vmatpush3.bf16.msra.mxu1 %v1380_v59 }
  0x77   : > { %1250 = vmatprep.subr.bf16.mxu0 %v1507_v0 }
  0x79   : > { %1227 = vmatmul.mubr.bf16.vlgmr.msra.gmra.mrb[4].mxu0 %v585_v1  ;;  %1247 = vmatmul.mubr.bf16.vlgmr.msra.gmra.mrb[4].mxu1 %v715_v3 }
  0x7a   : > { %1251 = vmatpush3.bf16.msra.mxu0 %v1382_v2  ;;  %1266 = vmatprep.mubr.msk.bf16.mxu0 %vm1508_vm1, %v1507_v0 }
  0x7b   : > { %1252 = vmatprep.subr.bf16.mxu0 %v1507_v0 }
  0x7e   : > { %1253 = vmatpush3.bf16.msra.mxu0 %v1384_v4 }
  0x7f   : > { %1254 = vmatprep.subr.bf16.mxu0 %v1507_v0 }
  0x82   : > { %1255 = vmatpush3.bf16.msra.mxu0 %v1385_v5 }
  0x83   : > { %1256 = vmatprep.subr.bf16.mxu0 %v1507_v0 }
  0x86   : > { %1257 = vmatpush3.bf16.msra.mxu0 %v1386_v6 }
  0x87   : > { %1258 = vmatprep.subr.bf16.mxu0 %v1507_v0 }
  0x8a   : > { %1259 = vmatpush3.bf16.msra.mxu0 %v1387_v7 }
  0x8b   : > { %1260 = vmatprep.subr.bf16.mxu0 %v1507_v0 }
  0x8e   : > { %1261 = vmatpush3.bf16.msra.mxu0 %v1388_v8 }
  0x8f   : > { %1262 = vmatprep.subr.bf16.mxu0 %v1507_v0 }
  0x92   : > { %1263 = vmatpush3.bf16.msra.mxu0 %v1389_v10 }
  0x93   : > { %1264 = vmatprep.subr.bf16.mxu0 %v1507_v0 }
  0x96   : > { %1265 = vmatpush3.bf16.msra.mxu0 %v1390_v12 }
  0x99   : > { %1267 = vmatmul.mubr.bf16.vlgmr.msra.gmra.mrb[8].mxu0 %v831_v15 }
 0x12c   : > { %v460_v16 = vpop.f32.mrb[0].mxu0  ;;  %v555_v17 = vpop.f32.mrb[0].mxu1 }
 0x12d   : > { %v556_v18 = vadd.f32 %v555_v17, %v460_v16  ;;  %v1188_v19 = vpop.f32.mrb[1].mxu0  ;;  %v1208_v21 = vpop.f32.mrb[1].mxu1 }
 0x12e   : > { %v463_v22 = vpop.f32.mrb[2].mxu0  ;;  %v558_v20 = vpop.f32.mrb[2].mxu1 }
 0x12f   : > { %v559_v23 = vadd.f32 %v558_v20, %v463_v22  ;;  %v1189_v24 = vpop.f32.mrb[3].mxu0  ;;  %v1209_v25 = vpop.f32.mrb[3].mxu1 }
 0x14c   : > { %v669_v26 = vpop.f32.mrb[4].mxu0  ;;  %v799_v27 = vpop.f32.mrb[4].mxu1 }
 0x14d   : > { %v676_v28 = vadd.f32 %v669_v26, %v556_v18  ;;  %v1228_v29 = vpop.f32.mrb[5].mxu0  ;;  %v1248_v0 = vpop.f32.mrb[5].mxu1 }
 0x14e   : > { %v672_v30 = vpop.f32.mrb[6].mxu0  ;;  %v802_v31 = vpop.f32.mrb[6].mxu1 }
 0x14f   : > { %v677_v32 = vadd.f32 %v672_v30, %v559_v23  ;;  %v806_v33 = vadd.f32 %v799_v27, %v676_v28  ;;  %v1229_v34 = vpop.f32.mrb[7].mxu0  ;;  %v1249_v35 = vpop.f32.mrb[7].mxu1 }
 0x151   : > { %v807_v36 = vadd.f32 %v802_v31, %v677_v32 }
 0x16c   : > { %v915_v37 = vpop.f32.mrb[8].mxu0 }
 0x16d   : > { %v922_v39 = vadd.f32 %v915_v37, %v806_v33  ;;  %v1268_v40 = vpop.f32.mrb[9].mxu0 }
 0x16e   : > { %v918_v41 = vpop.f32.mrb[10].mxu0 }
 0x16f   : > { %v931_v42 = vadd.f32 %v1116_v38, %v922_v39  ;;  %v923_v43 = vadd.f32 %v918_v41, %v807_v36  ;;  %v1269_v44 = vpop.f32.mrb[11].mxu0 }
 0x171   : > { %933 = vst [vmem:[%s275_s24] sm:$0xff] %v931_v42  ;;  %v932_v45 = vadd.f32 %v1116_v38, %v923_v43 }
 0x173   : > { %934 = vst [vmem:[%s275_s24 + $0x8] sm:$0xff] %v932_v45 }
 0x174   : > { %1433 = shalt.err (!%p1430_p6)
}
 0x175   : > { %s1434_s11 = scalar_lea.hbm %s1713_s6, 256  ;;  %s1438_s14 = scalar_lea.hbm %s1765_s4, 512 }
 0x176   : > { %p1435_p7 = scmp.ne.s32.totalorder %s1713_s6, %s1434_s11  ;;  %p1439_p0 = scmp.lt.u32.totalorder %s1713_s6, %s1765_s4 }
 0x177   : > { %p1440_p2 = scmp.lt.u32.totalorder %s1438_s14, %s1434_s11  ;;  %p1442_p8 = scmp.lt.u32.totalorder %s1434_s11, %s1713_s6 }
 0x178   : > { %p1436_p9 = pnand %p1435_p7, %p1777_p10 }
 0x179   : > { %p1441_p4 = por %p1440_p2, %p1439_p0 }
 0x17a   : > { %p1437_p12 = pneg %p1436_p9 }
 0x17b   : > { %p1443_p11 = por %p1442_p8, %p1441_p4 }
 0x17d   : > { %p1444_p13 = pnand %p1443_p11, %p1437_p12 }
 0x17f   : > { %1447 = shalt.err (!%p1444_p13)
}
 0x180   : > { %s1511_s24 = smov 128   ;;  %s1512_s5 = smov 8  }
 0x181   : > { %1276 = dma.vmem_to_hbm [thread:$0]  (%p1777_p10), %s1708_s26, 256, %s1713_s6, %s1715_s7, %s1511_s24, %s1511_s24, %s1512_s5  }
 0x182 PF: > { %p1289_p1 = scmp.ge.s32.totalorder %s1502_s20, 2  ;;  %s966_s29 = sand.u32 1, %s1482_s15  }
 0x183   : > { %p1778_p3 = scmp.ne.s32.totalorder %s1771_s27, 0  ;;  %s967_s30 = scalar_lea.sflag [#allocation5], %s966_s29 }
 0x185   : > { %p1283_p5 = pnand %p1289_p1, %p1778_p3 }
 0x187   : > { %1477 = dma.done.wait (!%p1283_p5), %s967_s30, 256  }
 0x188   : > { %1479 = vsyncadd (!%p1283_p5), %s967_s30, 4294967040  ;;  %s18_s20 = sadd.s32 1, %s1502_s20   ;;  %s1779_s15 = smov %s1486_s16 }
 0x189   : > { %p15_p6 = scmp.ge.s32.totalorder %s18_s20, 4   ;;  %s1780_s16 = smov %s1490_s17 }
 0x18a   : > { %s1781_s17 = smov %s1591_s28  ;;  %s1782_s18 = smov %s1498_s19 }
 0x18b   : > { %s1783_s19 = smov %s1785_s23  ;;  %17 = sbr.rel (!%p15_p6) target bundleno = 5 (0x5), region = 79 }
 0x192   :  { %972 = vsyncpa [#allocation4], 1 }
 0x193   :  { %974 = vsyncpa [#allocation4 + $0x1], 1 }
 0x194   :  { %975 = vsyncpa [#allocation5], 1 }
 0x195   :  { %977 = vsyncpa [#allocation5 + $0x1], 1 }

// kernel: tpu_custom_call.1
= control target key start
LH: loop header
LB: loop body
LE: loop exit
PB: predicated region body
PF: predicated region fallthrough
CT: control target
= control target key end

     0   :  { %9 = vsyncpa [#allocation4], 0  ;;  %s1761_s0 = inlined_call_operand.vmem [shape: bf16[2,24,4], index: 0, kind: input, shape index: {}]   ;;  %s1762_s1 = inlined_call_operand.vmem [shape: bf16[2,24,4], index: 1, kind: input, shape index: {}]   ;;  %s1763_s2 = inlined_call_operand.hbm [shape: bf16[640,128], index: 2, kind: input, shape index: {}]   ;;  %s1764_s3 = inlined_call_operand.vmem [shape: f32[1,128], index: 3, kind: input, shape index: {}]   ;;  %s1765_s4 = inlined_call_operand.hbm [shape: f32[2,16,128], index: 4, kind: output, shape index: {}]  }
   0x1   :  { %10 = vsyncpa [#allocation5], 0 }
   0x2   :  { %12 = vsyncpa [#allocation5 + $0x1], 0  ;;  %s1538_s15 = smov 0   ;;  %s1540_s16 = smov 0  }
   0x3   :  { %s1542_s17 = smov 0   ;;  %s1544_s18 = smov 0  }
   0x4   :  { %s1546_s19 = smov 0   ;;  %s1548_s20 = smov 0  }
   0x5 LB: > { %s1060_s21 = sadd.s32 4294967295, %s1502_s20   ;;  %s1061_s22 = sadd.s32 4294967294, %s1502_s20   ;;  %s1502_s20 = sphi %s1548_s20, %s18_s20   ;;  %s1498_s19 = sphi %s1546_s19, %s1783_s19   ;;  %s1494_s18 = sphi %s1544_s18, %s1782_s18   ;;  %s1490_s17 = sphi %s1542_s17, %s1781_s17   ;;  %s1486_s16 = sphi %s1540_s16, %s1780_s16   ;;  %s1482_s15 = sphi %s1538_s15, %s1779_s15  }
   0x6   : > { %s30_s23 = sadd.s32 1, %s1498_s19  ;;  %s141_s24 = sadd.s32 1, %s1490_s17 }
   0x7   : > { %p32_p0 = scmp.ge.s32.totalorder %s30_s23, 2  ;;  %p151_p1 = scmp.ne.s32.totalorder %s1490_s17, %s1486_s16 }
   0x8   : > { %p152_p2 = scmp.eq.s32.totalorder %s1060_s21, 1  ;;  %p157_p3 = scmp.ne.s32.totalorder %s1486_s16, %s1482_s15 }
   0x9   : > { %s1785_s23 = smov (%p32_p0, %s30_s23), 0  ;;  %p158_p5 = scmp.eq.s32.totalorder %s1061_s22, 1 }
   0xa   : > { %p1578_p4 = por %p152_p2, %p151_p1  ;;  %s136_s26 = ssub.s32 %s1498_s19, %s1785_s23 }
   0xb   : > { %p1062_p6 = scmp.ge.s32.totalorder %s1502_s20, 1  ;;  %p139_p7 = scmp.eq.s32.totalorder %s136_s26, 0 }
   0xc   : > { %s1770_s25 = scalar_select %p1578_p4, 1, 0 }
   0xd   : > { %p1585_p8 = por %p158_p5, %p157_p3  ;;  %p165_p9 = scmp.lt.s32.totalorder %s1502_s20, 3 }
   0xe   : > { %s1591_s28 = scalar_select %p139_p7, %s1490_s17, %s141_s24  }
   0xf   : > { %s1771_s27 = scalar_select %p1585_p8, 1, 0 }
  0x10   : > { %p1593_p10 = pnand %p1062_p6, %p165_p9  ;;  %p1597_p11 = scmp.eq.s32.totalorder %s1060_s21, 0 }
  0x11   : > { %s1504_s5 = smov [#allocation3]   ;;  %s1392_s10 = scalar_lea.hbm %s1763_s2, 5120 }
  0x12   : > { %s1772_s29 = scalar_select %p1593_p10, 1, 0 }
  0x13   : > { %s1773_s30 = scalar_select %p1597_p11, 1, 0 }
  0x14   : > { %p1278_p12 = pneg %p1593_p10  ;;  %s177_s6 = sshll.u32 %s1504_s5, 4  ;;  %s178_s6 = int_to_ptr.vmem [resolvable:$true] %s177_s6 }
  0x15   : > { %p1393_p0 = scmp.ne.s32.totalorder %s1763_s2, %s1392_s10  ;;  %p1399_p5 = scmp.lt.u32.totalorder %s1392_s10, %s1763_s2 }
  0x16   : > { %p1605_p13 = pnand %p1597_p11, %p1278_p12 }
  0x18   : > { %p1394_p1 = pneg %p1605_p13 }
  0x1a   : > { %p1395_p2 = pnand %p1394_p1, %p1393_p0 }
  0x1c   : > { %p1396_p3 = pneg %p1395_p2 }
  0x1e   : > { %p1401_p6 = pnand %p1399_p5, %p1396_p3 }
  0x20   : > { %1404 = shalt.err (!%p1401_p6)
}
  0x21   : > { %s1405_s21 = scalar_lea.vmem %s178_s6, 5120  ;;  %p1413_p8 = scmp.lt.s32.totalorder %s178_s6, %s178_s6 }
  0x22   : > { %p1406_p7 = scmp.ne.s32.totalorder %s178_s6, %s1405_s21  ;;  %p1414_p4 = scmp.lt.s32.totalorder %s1405_s21, %s1405_s21 }
  0x24   : > { %p1408_p9 = pnand %p1406_p7, %p1394_p1  ;;  %p1415_p11 = por %p1414_p4, %p1413_p8 }
  0x26   : > { %p1409_p12 = pneg %p1408_p9 }
  0x28   : > { %p1416_p10 = pnand %p1415_p11, %p1409_p12 }
  0x2a   : > { %1419 = shalt.err (!%p1416_p10)
}
  0x2b   : > { %s1505_s22 = smov 64   ;;  %s1506_s24 = smov 4  }
  0x2c   : > { %1281 = dma.hbm_to_vmem [thread:$0]  (!%p1605_p13), %s1763_s2, 5120, %s178_s6, [#allocation4], %s1505_s22, %s1505_s22, %s1506_s24  }
  0x2d   : > { %p1775_p0 = scmp.ne.s32.totalorder %s1772_s29, 0 }
  0x2e   : > { %p1776_p2 = scmp.ne.s32.totalorder (!%p1775_p0), %s1773_s30, 0 }
  0x2f   : > { %232 = sbr.rel (%p1775_p0) target bundleno = 386 (0x182), region = 36 }
  0x36   : > { %1473 = dma.done.wait (%p1776_p2), [#allocation4], 5120  }
  0x37   : > { %1475 = vsyncadd (%p1776_p2), [#allocation4], 4294962176  ;;  %p281_p4 = scmp.lt.s32.totalorder %s1494_s18, 1  ;;  %vm308_vm0 = vcmask 1043488   ;;  %v1507_v0 = vmov 0.0   ;;  %vm1508_vm1 = vmmov 0  }
  0x38   : > { %1170 = vmatprep.subr.bf16.mxu0 %v1507_v0  ;;  %1190 = vmatprep.subr.bf16.mxu1 %v1507_v0  ;;  %v1509_v1 = vmov 0   ;;  %v1346_v2 = vld [vmem:[#allocation3 + $0x40] sm:$0xff]   ;;  %v1348_v4 = vld [vmem:[#allocation3 + $0x48] sm:$0xff]   ;;  %v1350_v6 = vld [vmem:[#allocation3 + $0x50] sm:$0xff]   ;;  %vm314_vm2 = vcmask 27648   ;;  %vm582_vm4 = vcmask 1046528  }
  0x39   : > { %1186 = vmatprep.mubr.msk.bf16.mxu0 %vm1508_vm1, %v1507_v0  ;;  %1206 = vmatprep.mubr.msk.bf16.mxu1 %vm1508_vm1, %v1507_v0  ;;  %309 = vst.msk [vmem:[#allocation2] sm:$0xf] %vm308_vm0, %v1509_v1  ;;  %310 = vst.msk [vmem:[#allocation2 + $0x4] sm:$0xf] %vm308_vm0, %v1509_v1  ;;  %s282_s29 = scalar_select %p281_p4, %s1494_s18, 1  ;;  %v1347_v3 = vld [vmem:[#allocation3] sm:$0xff]  }
  0x3a   : > { %311 = vst.msk [vmem:[#allocation2 + $0x8] sm:$0xf] %vm308_vm0, %v1509_v1  ;;  %1171 = vmatpush3.bf16.msra.mxu0 %v1346_v2  ;;  %1191 = vmatpush3.bf16.msra.mxu1 %v1347_v3  ;;  %v1349_v5 = vld [vmem:[#allocation3 + $0x8] sm:$0xff]   ;;  %v1351_v7 = vld [vmem:[#allocation3 + $0x10] sm:$0xff]   ;;  %v1352_v8 = vld [vmem:[#allocation3 + $0x58] sm:$0xff]   ;;  %vm828_vm6 = vcmask 1045504  }
  0x3b   : > { %1172 = vmatprep.subr.bf16.mxu0 %v1507_v0  ;;  %1192 = vmatprep.subr.bf16.mxu1 %v1507_v0  ;;  %s1270_s30 = smul.u32 12, %s282_s29  ;;  %v1353_v9 = vld [vmem:[#allocation3 + $0x18] sm:$0xff]   ;;  %v1354_v10 = vld [vmem:[#allocation3 + $0x60] sm:$0xff]   ;;  %v1356_v15 = vld [vmem:[#allocation3 + $0x68] sm:$0xff]   ;;  %vm364_vm3 = vsmask.f32 7424 }
  0x3c   : > { %v1355_v11 = vld [vmem:[#allocation3 + $0x20] sm:$0xff]   ;;  %v1357_v16 = vld [vmem:[#allocation3 + $0x28] sm:$0xff]   ;;  %v1358_v17 = vld [vmem:[#allocation3 + $0x70] sm:$0xff]   ;;  %vm698_vm5 = vsmask.f32 6400  ;;  %s273_s13 = sand.u32 1, %s1486_s16  }
  0x3d   : > { %s1123_s6 = sadd.s32 8, %s1270_s30  ;;  %s288_s9 = scalar_lea.vmem %s1761_s0, %s1270_s30  ;;  %v1359_v18 = vld [vmem:[#allocation3 + $0x30] sm:$0xff]   ;;  %v1360_v21 = vld [vmem:[#allocation3 + $0x78] sm:$0xff]   ;;  %v1365_v31 = vld [vmem:[#allocation3 + $0x80] sm:$0xff]  }
  0x3e   : > { %1173 = vmatpush3.bf16.msra.mxu0 %v1348_v4  ;;  %1193 = vmatpush3.bf16.msra.mxu1 %v1349_v5  ;;  %s303_s12 = scalar_lea.vmem %s1762_s1, %s1123_s6  ;;  %v312_v12 = vld [vmem:[%s288_s9] sm:$0xf]  ;;  %v313_v13 = vld [vmem:[%s288_s9 + $0x4] sm:$0xf]  ;;  %v1367_v35 = vld [vmem:[#allocation3 + $0x88] sm:$0xff]   ;;  %s1067_s14 = sshll.u32 %s273_s13, 4 }
  0x3f   : > { %1174 = vmatprep.subr.bf16.mxu0 %v1507_v0  ;;  %1194 = vmatprep.subr.bf16.mxu1 %v1507_v0  ;;  %v317_v14 = vld [vmem:[%s303_s12] sm:$0xf]  ;;  %315 = vst.msk [vmem:[#allocation2] sm:$0xf] %vm314_vm2, %v312_v12  ;;  %316 = vst.msk [vmem:[#allocation2 + $0x4] sm:$0xf] %vm314_vm2, %v313_v13 }
  0x40   : > { %318 = vst.msk [vmem:[#allocation2 + $0x8] sm:$0xf] %vm314_vm2, %v317_v14  ;;  %v1361_v24 = vld [vmem:[#allocation3 + $0x38] sm:$0xff]   ;;  %v1366_v33 = vld [vmem:[#allocation3 + $0xc0] sm:$0xff]   ;;  %v1368_v36 = vld [vmem:[#allocation3 + $0xc8] sm:$0xff]   ;;  %s275_s24 = scalar_lea.vmem [#allocation6], %s1067_s14 }
  0x41   : > { %v1369_v37 = vld [vmem:[#allocation3 + $0x90] sm:$0xff]   ;;  %v1371_v39 = vld [vmem:[#allocation3 + $0x98] sm:$0xff]   ;;  %v1373_v42 = vld [vmem:[#allocation3 + $0xa0] sm:$0xff]   ;;  %s951_s26 = sshll.u32 %s275_s24, 4  ;;  %s1124_s5 = sshll.u32 %s1494_s18, 8  ;;  %s1708_s26 = int_to_ptr.vmem [resolvable:$true] %s951_s26 }
  0x42   : > { %1175 = vmatpush3.bf16.msra.mxu0 %v1350_v6  ;;  %1195 = vmatpush3.bf16.msra.mxu1 %v1351_v7  ;;  %v1370_v38 = vld [vmem:[#allocation3 + $0xd0] sm:$0xff]   ;;  %v1372_v40 = vld [vmem:[#allocation3 + $0xd8] sm:$0xff]   ;;  %v1374_v43 = vld [vmem:[#allocation3 + $0xe0] sm:$0xff]   ;;  %s1713_s6 = scalar_lea.hbm %s1765_s4, %s1124_s5  ;;  %s1715_s7 = scalar_lea.sflag [#allocation5], %s273_s13 }
  0x43   : > { %1176 = vmatprep.subr.bf16.mxu0 %v1507_v0  ;;  %1196 = vmatprep.subr.bf16.mxu1 %v1507_v0  ;;  %v1375_v46 = vld [vmem:[#allocation3 + $0xa8] sm:$0xff]   ;;  %v1377_v52 = vld [vmem:[#allocation3 + $0xb0] sm:$0xff]   ;;  %v1379_v58 = vld [vmem:[#allocation3 + $0xb8] sm:$0xff]   ;;  %s1420_s18 = scalar_lea.vmem %s1708_s26, 256  ;;  %p1777_p10 = scmp.ne.s32.totalorder %s1770_s25, 0 }
  0x44   : > { %v1376_v47 = vld [vmem:[#allocation3 + $0xe8] sm:$0xff]   ;;  %v1378_v53 = vld [vmem:[#allocation3 + $0xf0] sm:$0xff]   ;;  %v1380_v59 = vld [vmem:[#allocation3 + $0xf8] sm:$0xff]   ;;  %p1421_p8 = scmp.ne.s32.totalorder %s1708_s26, %s1420_s18  ;;  %s1510_s8 = smov [#allocation6]  }
  0x45   : > { %v1382_v2 = vld [vmem:[#allocation3 + $0x100] sm:$0xff]   ;;  %v1384_v4 = vld [vmem:[#allocation3 + $0x108] sm:$0xff]   ;;  %v1385_v5 = vld [vmem:[#allocation3 + $0x110] sm:$0xff]   ;;  %s1424_s9 = sshll.u32 %s1510_s8, 4  ;;  %s1425_s9 = int_to_ptr.vmem [resolvable:$false] %s1424_s9 }
  0x46   : > { %1177 = vmatpush3.bf16.msra.mxu0 %v1352_v8  ;;  %1197 = vmatpush3.bf16.msra.mxu1 %v1353_v9  ;;  %v337_v19 = vld [vmem:[#allocation2] sm:$0xf]  ;;  %v1657_v20 = vld [vmem:[#allocation2 + $0x4] sm:$0xf]  ;;  %v1387_v7 = vld [vmem:[#allocation3 + $0x120] sm:$0xff]   ;;  %p1422_p11 = pnand %p1421_p8, %p1777_p10  ;;  %s1426_s10 = scalar_lea.vmem %s1425_s9, 512 }
  0x47   : > { %1178 = vmatprep.subr.bf16.mxu0 %v1507_v0  ;;  %1198 = vmatprep.subr.bf16.mxu1 %v1507_v0  ;;  %v1070_v22 = vcombine.low %v337_v19, %v1657_v20  ;;  %v1660_v23 = vld [vmem:[#allocation2 + $0x8] ss:$0 sps:$4 sm:$0x11]   ;;  %v1364_v30 = vld [vmem:[#allocation2] sm:$0xff]   ;;  %v1388_v8 = vld [vmem:[#allocation3 + $0x128] sm:$0xff]   ;;  %p1427_p1 = scmp.lt.s32.totalorder %s1708_s26, %s1425_s9  ;;  %p1428_p3 = scmp.lt.s32.totalorder %s1426_s10, %s1420_s18 }
  0x48   : > { %v373_v27 = vshll.u32 %v1660_v23, 16  ;;  %v562_v41 = vld [vmem:[#allocation2] sm:$0xe]  ;;  %v1678_v45 = vld [vmem:[#allocation2 + $0x8] ss:$0 sps:$4 sm:$0x33]   ;;  %p1423_p13 = pneg %p1422_p11 }
  0x49   : > { %v366_v25 = vshrl.u32 %v1070_v22, 16  ;;  %v368_v26 = vshll.u32 %v1070_v22, 16  ;;  %v1089_v44 = vcombine.low %v562_v41, %v1657_v20  ;;  %v708_v50 = vshrl.u32 %v1678_v45, 16  ;;  %v1386_v6 = vld [vmem:[#allocation3 + $0x118] sm:$0xff]   ;;  %v808_v9 = vld [vmem:[#allocation2] sm:$0xc]  ;;  %p1429_p5 = por %p1428_p3, %p1427_p1 }
  0x4a   : > { %1179 = vmatpush3.bf16.msra.mxu0 %v1354_v10  ;;  %1199 = vmatpush3.bf16.msra.mxu1 %v1355_v11  ;;  %v375_v29 = vrot.slane %v373_v27, 1  ;;  %v711_v51 = vshll.u32 %v1678_v45, 16  ;;  %v584_v61 = vrot.slane %v1660_v23, 1  ;;  %v1389_v10 = vld [vmem:[#allocation3 + $0x130] sm:$0xff]   ;;  %v1107_v11 = vcombine.low %v808_v9, %v1657_v20  ;;  %v1390_v12 = vld [vmem:[#allocation3 + $0x138] sm:$0xff]  }
  0x4b   : > { %1180 = vmatprep.subr.bf16.mxu0 %v1507_v0  ;;  %1200 = vmatprep.subr.bf16.mxu1 %v1507_v0  ;;  %v370_v28 = vrot.slane %v368_v26, 1  ;;  %v700_v48 = vshrl.u32 %v1089_v44, 16  ;;  %v703_v49 = vshll.u32 %v1089_v44, 16  ;;  %v710_v56 = vrot.slane %v708_v50, 1  ;;  %p1430_p6 = pnand %p1429_p5, %p1423_p13 }
  0x4c   : > { %v713_v57 = vrot.slane %v711_v51, 2  ;;  %v583_v60 = vrot.slane %v1089_v44, 1  ;;  %v829_v13 = vrot.slane %v1107_v11, 2  ;;  %v830_v14 = vrot.slane %v1678_v45, 2 }
  0x4d   : > { %v371_v32 = vor.u32 %v370_v28, %v366_v25  ;;  %v702_v54 = vrot.slane %v700_v48, 1  ;;  %v705_v55 = vrot.slane %v703_v49, 2 }
  0x4e   : > { %1181 = vmatpush3.bf16.msra.mxu0 %v1356_v15  ;;  %1201 = vmatpush3.bf16.msra.mxu1 %v1357_v16  ;;  %v714_v63 = vor.u32 %v713_v57, %v710_v56  ;;  %v585_v1 = vsel %vm582_vm4, %v583_v60, %v584_v61  ;;  %v831_v15 = vsel %vm828_vm6, %v829_v13, %v830_v14 }
  0x4f   : > { %1182 = vmatprep.subr.bf16.mxu0 %v1507_v0  ;;  %1202 = vmatprep.subr.bf16.mxu1 %v1507_v0  ;;  %v376_v34 = vsel %vm364_vm3, %v371_v32, %v375_v29  ;;  %v706_v62 = vor.u32 %v705_v55, %v702_v54 }
  0x51   : > { %v715_v3 = vsel %vm698_vm5, %v706_v62, %v714_v63 }
  0x52   : > { %1183 = vmatpush3.bf16.msra.mxu0 %v1358_v17  ;;  %1203 = vmatpush3.bf16.msra.mxu1 %v1359_v18 }
  0x53   : > { %1184 = vmatprep.subr.bf16.mxu0 %v1507_v0  ;;  %1204 = vmatprep.subr.bf16.mxu1 %v1507_v0 }
  0x56   : > { %1185 = vmatpush3.bf16.msra.mxu0 %v1360_v21  ;;  %1205 = vmatpush3.bf16.msra.mxu1 %v1361_v24 }
  0x57   : > { %1210 = vmatprep.subr.bf16.mxu0 %v1507_v0  ;;  %1230 = vmatprep.subr.bf16.mxu1 %v1507_v0 }
  0x59   : > { %1187 = vmatmul.mubr.bf16.vlgmr.msra.gmra.mrb[0].mxu0 %v376_v34  ;;  %1207 = vmatmul.mubr.bf16.vlgmr.msra.gmra.mrb[0].mxu1 %v1364_v30 }
  0x5a   : > { %1211 = vmatpush3.bf16.msra.mxu0 %v1365_v31  ;;  %1231 = vmatpush3.bf16.msra.mxu1 %v1366_v33 }
  0x5b   : > { %1212 = vmatprep.subr.bf16.mxu0 %v1507_v0  ;;  %1232 = vmatprep.subr.bf16.mxu1 %v1507_v0 }
  0x5c   : > { %1226 = vmatprep.mubr.msk.bf16.mxu0 %vm1508_vm1, %v1507_v0  ;;  %1246 = vmatprep.mubr.msk.bf16.mxu1 %vm1508_vm1, %v1507_v0 }
  0x5e   : > { %1213 = vmatpush3.bf16.msra.mxu0 %v1367_v35  ;;  %1233 = vmatpush3.bf16.msra.mxu1 %v1368_v36 }
  0x5f   : > { %1214 = vmatprep.subr.bf16.mxu0 %v1507_v0  ;;  %1234 = vmatprep.subr.bf16.mxu1 %v1507_v0 }
  0x62   : > { %1215 = vmatpush3.bf16.msra.mxu0 %v1369_v37  ;;  %1235 = vmatpush3.bf16.msra.mxu1 %v1370_v38  ;;  %v1116_v38 = vld [vmem:[%s1764_s3] ss:$0 sm:$0xff] }
  0x63   : > { %1216 = vmatprep.subr.bf16.mxu0 %v1507_v0  ;;  %1236 = vmatprep.subr.bf16.mxu1 %v1507_v0 }
  0x66   : > { %1217 = vmatpush3.bf16.msra.mxu0 %v1371_v39  ;;  %1237 = vmatpush3.bf16.msra.mxu1 %v1372_v40 }
  0x67   : > { %1218 = vmatprep.subr.bf16.mxu0 %v1507_v0  ;;  %1238 = vmatprep.subr.bf16.mxu1 %v1507_v0 }
  0x6a   : > { %1219 = vmatpush3.bf16.msra.mxu0 %v1373_v42  ;;  %1239 = vmatpush3.bf16.msra.mxu1 %v1374_v43 }
  0x6b   : > { %1220 = vmatprep.subr.bf16.mxu0 %v1507_v0  ;;  %1240 = vmatprep.subr.bf16.mxu1 %v1507_v0 }
  0x6e   : > { %1221 = vmatpush3.bf16.msra.mxu0 %v1375_v46  ;;  %1241 = vmatpush3.bf16.msra.mxu1 %v1376_v47 }
  0x6f   : > { %1222 = vmatprep.subr.bf16.mxu0 %v1507_v0  ;;  %1242 = vmatprep.subr.bf16.mxu1 %v1507_v0 }
  0x72   : > { %1223 = vmatpush3.bf16.msra.mxu0 %v1377_v52  ;;  %1243 = vmatpush3.bf16.msra.mxu1 %v1378_v53 }
  0x73   : > { %1224 = vmatprep.subr.bf16.mxu0 %v1507_v0  ;;  %1244 = vmatprep.subr.bf16.mxu1 %v1507_v0 }
  0x76   : > { %1225 = vmatpush3.bf16.msra.mxu0 %v1379_v58  ;;  %1245 = vmatpush3.bf16.msra.mxu1 %v1380_v59 }
  0x77   : > { %1250 = vmatprep.subr.bf16.mxu0 %v1507_v0 }
  0x79   : > { %1227 = vmatmul.mubr.bf16.vlgmr.msra.gmra.mrb[4].mxu0 %v585_v1  ;;  %1247 = vmatmul.mubr.bf16.vlgmr.msra.gmra.mrb[4].mxu1 %v715_v3 }
  0x7a   : > { %1251 = vmatpush3.bf16.msra.mxu0 %v1382_v2  ;;  %1266 = vmatprep.mubr.msk.bf16.mxu0 %vm1508_vm1, %v1507_v0 }
  0x7b   : > { %1252 = vmatprep.subr.bf16.mxu0 %v1507_v0 }
  0x7e   : > { %1253 = vmatpush3.bf16.msra.mxu0 %v1384_v4 }
  0x7f   : > { %1254 = vmatprep.subr.bf16.mxu0 %v1507_v0 }
  0x82   : > { %1255 = vmatpush3.bf16.msra.mxu0 %v1385_v5 }
  0x83   : > { %1256 = vmatprep.subr.bf16.mxu0 %v1507_v0 }
  0x86   : > { %1257 = vmatpush3.bf16.msra.mxu0 %v1386_v6 }
  0x87   : > { %1258 = vmatprep.subr.bf16.mxu0 %v1507_v0 }
  0x8a   : > { %1259 = vmatpush3.bf16.msra.mxu0 %v1387_v7 }
  0x8b   : > { %1260 = vmatprep.subr.bf16.mxu0 %v1507_v0 }
  0x8e   : > { %1261 = vmatpush3.bf16.msra.mxu0 %v1388_v8 }
  0x8f   : > { %1262 = vmatprep.subr.bf16.mxu0 %v1507_v0 }
  0x92   : > { %1263 = vmatpush3.bf16.msra.mxu0 %v1389_v10 }
  0x93   : > { %1264 = vmatprep.subr.bf16.mxu0 %v1507_v0 }
  0x96   : > { %1265 = vmatpush3.bf16.msra.mxu0 %v1390_v12 }
  0x99   : > { %1267 = vmatmul.mubr.bf16.vlgmr.msra.gmra.mrb[8].mxu0 %v831_v15 }
 0x12c   : > { %v460_v16 = vpop.f32.mrb[0].mxu0  ;;  %v555_v17 = vpop.f32.mrb[0].mxu1 }
 0x12d   : > { %v556_v18 = vadd.f32 %v555_v17, %v460_v16  ;;  %v1188_v19 = vpop.f32.mrb[1].mxu0  ;;  %v1208_v21 = vpop.f32.mrb[1].mxu1 }
 0x12e   : > { %v463_v22 = vpop.f32.mrb[2].mxu0  ;;  %v558_v20 = vpop.f32.mrb[2].mxu1 }
 0x12f   : > { %v559_v23 = vadd.f32 %v558_v20, %v463_v22  ;;  %v1189_v24 = vpop.f32.mrb[3].mxu0  ;;  %v1209_v25 = vpop.f32.mrb[3].mxu1 }
 0x14c   : > { %v669_v26 = vpop.f32.mrb[4].mxu0  ;;  %v799_v27 = vpop.f32.mrb[4].mxu1 }
 0x14d   : > { %v676_v28 = vadd.f32 %v669_v26, %v556_v18  ;;  %v1228_v29 = vpop.f32.mrb[5].mxu0  ;;  %v1248_v0 = vpop.f32.mrb[5].mxu1 }
 0x14e   : > { %v672_v30 = vpop.f32.mrb[6].mxu0  ;;  %v802_v31 = vpop.f32.mrb[6].mxu1 }
 0x14f   : > { %v677_v32 = vadd.f32 %v672_v30, %v559_v23  ;;  %v806_v33 = vadd.f32 %v799_v27, %v676_v28  ;;  %v1229_v34 = vpop.f32.mrb[7].mxu0  ;;  %v1249_v35 = vpop.f32.mrb[7].mxu1 }
 0x151   : > { %v807_v36 = vadd.f32 %v802_v31, %v677_v32 }
 0x16c   : > { %v915_v37 = vpop.f32.mrb[8].mxu0 }
 0x16d   : > { %v922_v39 = vadd.f32 %v915_v37, %v806_v33  ;;  %v1268_v40 = vpop.f32.mrb[9].mxu0 }
 0x16e   : > { %v918_v41 = vpop.f32.mrb[10].mxu0 }
 0x16f   : > { %v931_v42 = vadd.f32 %v1116_v38, %v922_v39  ;;  %v923_v43 = vadd.f32 %v918_v41, %v807_v36  ;;  %v1269_v44 = vpop.f32.mrb[11].mxu0 }
 0x171   : > { %933 = vst [vmem:[%s275_s24] sm:$0xff] %v931_v42  ;;  %v932_v45 = vadd.f32 %v1116_v38, %v923_v43 }
 0x173   : > { %934 = vst [vmem:[%s275_s24 + $0x8] sm:$0xff] %v932_v45 }
 0x174   : > { %1433 = shalt.err (!%p1430_p6)
}
 0x175   : > { %s1434_s11 = scalar_lea.hbm %s1713_s6, 256  ;;  %s1438_s14 = scalar_lea.hbm %s1765_s4, 512 }
 0x176   : > { %p1435_p7 = scmp.ne.s32.totalorder %s1713_s6, %s1434_s11  ;;  %p1439_p0 = scmp.lt.u32.totalorder %s1713_s6, %s1765_s4 }
 0x177   : > { %p1440_p2 = scmp.lt.u32.totalorder %s1438_s14, %s1434_s11  ;;  %p1442_p8 = scmp.lt.u32.totalorder %s1434_s11, %s1713_s6 }
 0x178   : > { %p1436_p9 = pnand %p1435_p7, %p1777_p10 }
 0x179   : > { %p1441_p4 = por %p1440_p2, %p1439_p0 }
 0x17a   : > { %p1437_p12 = pneg %p1436_p9 }
 0x17b   : > { %p1443_p11 = por %p1442_p8, %p1441_p4 }
 0x17d   : > { %p1444_p13 = pnand %p1443_p11, %p1437_p12 }
 0x17f   : > { %1447 = shalt.err (!%p1444_p13)
}
 0x180   : > { %s1511_s24 = smov 128   ;;  %s1512_s5 = smov 8  }
 0x181   : > { %1276 = dma.vmem_to_hbm [thread:$0]  (%p1777_p10), %s1708_s26, 256, %s1713_s6, %s1715_s7, %s1511_s24, %s1511_s24, %s1512_s5  }
 0x182 PF: > { %p1289_p1 = scmp.ge.s32.totalorder %s1502_s20, 2  ;;  %s966_s29 = sand.u32 1, %s1482_s15  }
 0x183   : > { %p1778_p3 = scmp.ne.s32.totalorder %s1771_s27, 0  ;;  %s967_s30 = scalar_lea.sflag [#allocation5], %s966_s29 }
 0x185   : > { %p1283_p5 = pnand %p1289_p1, %p1778_p3 }
 0x187   : > { %1477 = dma.done.wait (!%p1283_p5), %s967_s30, 256  }
 0x188   : > { %1479 = vsyncadd (!%p1283_p5), %s967_s30, 4294967040  ;;  %s18_s20 = sadd.s32 1, %s1502_s20   ;;  %s1779_s15 = smov %s1486_s16 }
 0x189   : > { %p15_p6 = scmp.ge.s32.totalorder %s18_s20, 4   ;;  %s1780_s16 = smov %s1490_s17 }
 0x18a   : > { %s1781_s17 = smov %s1591_s28  ;;  %s1782_s18 = smov %s1498_s19 }
 0x18b   : > { %s1783_s19 = smov %s1785_s23  ;;  %17 = sbr.rel (!%p15_p6) target bundleno = 5 (0x5), region = 79 }
 0x192   :  { %972 = vsyncpa [#allocation4], 1 }
 0x193   :  { %974 = vsyncpa [#allocation4 + $0x1], 1 }
 0x194   :  { %975 = vsyncpa [#allocation5], 1 }
 0x195   :  { %977 = vsyncpa [#allocation5 + $0x1], 1 }

</bundles_post_ra>
